<compile_context>
chip_gen: v7x
topology: tpu7x:2x2x1
jax: 0.10.0
libtpu: 0.0.40
codegen_flags: <defaults>
</compile_context>

<pallas_src>
import jax
import jax.numpy as jnp
from jax.experimental import pallas as pl
from jax.experimental.pallas import tpu as pltpu


# ----------------------------------------------------------------------------- 
# Kernels
# -----------------------------------------------------------------------------
def se_kernel(x_ref, w1_ref, b1_ref, w2_ref, b2_ref, o_ref):
    # x_ref / o_ref : (Bblk, C, HW)   full-C, full-HW blocks of several images
    # w1_ref        : (C, Cs)         already scaled by 1/HW (mean folded in)
    # b1_ref        : (1, Cs)
    # w2_ref        : (Cs, C)
    # b2_ref        : (1, C)

    # --- squeeze: spatial sum (1/HW folded into w1), f32 accumulation ---
    s = jnp.sum(x_ref[...], axis=-1, dtype=jnp.float32)               # (Bblk, C)

    # --- excitation: Linear -> ReLU -> Linear -> Sigmoid ---
    z = jnp.dot(s, w1_ref[...], preferred_element_type=jnp.float32) + b1_ref[...]
    z = jnp.maximum(z, 0.0)
    a = jnp.dot(z, w2_ref[...], preferred_element_type=jnp.float32) + b2_ref[...]
    a = jax.nn.sigmoid(a)                                              # (Bblk, C)

    # --- scale: re-read x from VMEM, broadcast a over HW (multiply in x dtype;
    #     avoids widening the whole block to f32 -> keeps VMEM footprint tight) ---
    o_ref[...] = x_ref[...] * a[:, :, None].astype(o_ref.dtype)


def _make_pool_excite_kernel(hw_total):
    """Fallback phase 1: pooled sums over HW tiles + excitation at the last tile."""

    def kernel(x_ref, w1_ref, b1_ref, w2_ref, b2_ref, a_ref, s_acc):
        # x_ref : (1, C, hw_tile), a_ref : (1, C, 1) f32, s_acc : VMEM (1, C) f32
        t = pl.program_id(1)

        @pl.when(t == 0)
        def _():
            s_acc[...] = jnp.zeros_like(s_acc)

        xblk = x_ref[...].astype(jnp.float32)                          # (1, C, hw_t)
        hw_tile = xblk.shape[-1]
        if hw_total % hw_tile != 0:
            # Mask out the ragged tail (its VMEM contents are undefined).
            pos = t * hw_tile + jax.lax.broadcasted_iota(jnp.int32, xblk.shape, 2)
            xblk = jnp.where(pos < hw_total, xblk, 0.0)
        s_acc[...] += jnp.sum(xblk, axis=-1)                            # (1, C)

        @pl.when(t == pl.num_programs(1) - 1)
        def _():
            s = s_acc[...]                                              # (1, C)
            z = jnp.dot(s, w1_ref[...], preferred_element_type=jnp.float32) + b1_ref[...]
            z = jnp.maximum(z, 0.0)
            a = jnp.dot(z, w2_ref[...], preferred_element_type=jnp.float32) + b2_ref[...]
            a_ref[...] = jax.nn.sigmoid(a)[:, :, None]                  # (1, C, 1)

    return kernel


def scale_kernel(a_ref, x_ref, o_ref):
    """Fallback phase 2: stream x tiles and rescale by the per-channel gate."""
    # a_ref : (1, C, 1), x_ref / o_ref : (1, C, hw_tile)
    o_ref[...] = x_ref[...] * a_ref[...].astype(o_ref.dtype)


# ----------------------------------------------------------------------------- 
# Wrappers
# -----------------------------------------------------------------------------
def _vmem_budget_bytes():
    """~80% of this generation's physical VMEM (v5e/v6e 128 MiB, v7x 64 MiB/TC)."""
    try:
        cap = int(pltpu.get_tpu_info().vmem_capacity_bytes)
    except Exception:
        cap = 64 << 20  # conservative fallback (v7x per-core)
    return int(cap * 0.8)


def _se_large_image(xf, w1s, b1_2d, w2f, b2_2d, vmem_budget):
    """Two-kernel excite + streaming-scale split, HW-tiled (v7x large C*HW path)."""
    B, C, HW = xf.shape
    Cs = w1s.shape[1]
    dtype = xf.dtype
    itemsize = jnp.dtype(dtype).itemsize
    weight_bytes = (C * Cs + Cs * C + Cs + C) * 4
    slack = 4 << 20

    tile_cap = max((vmem_budget - 2 * weight_bytes - slack) // 4, C * 128 * itemsize)
    hw_tile = max(128, (tile_cap // (C * itemsize)) // 128 * 128)   # lane-dense tiles
    hw_tile = int(min(hw_tile, HW))
    n_hw = (HW + hw_tile - 1) // hw_tile

    tile_bytes = C * hw_tile * itemsize
    pool_needed = 2 * tile_bytes + 2 * weight_bytes + 16 * C + slack
    scale_needed = 4 * tile_bytes + 8 * C + slack
    pool_limit = int(min(vmem_budget, max(pool_needed, 16 << 20)))
    scale_limit = int(min(vmem_budget, max(scale_needed, 16 << 20)))

    # Phase 1: per-image channel gate a = sigmoid(relu(mean(x) @ W1 + b1) @ W2 + b2)
    a = pl.pallas_call(
        _make_pool_excite_kernel(HW),
        out_shape=jax.ShapeDtypeStruct((B, C, 1), jnp.float32),
        grid=(B, n_hw),
        in_specs=[
            pl.BlockSpec((1, C, hw_tile), lambda b, t: (b, 0, t)),
            pl.BlockSpec((C, Cs), lambda b, t: (0, 0)),
            pl.BlockSpec((1, Cs), lambda b, t: (0, 0)),
            pl.BlockSpec((Cs, C), lambda b, t: (0, 0)),
            pl.BlockSpec((1, C), lambda b, t: (0, 0)),
        ],
        out_specs=pl.BlockSpec((1, C, 1), lambda b, t: (b, 0, 0)),
        scratch_shapes=[pltpu.VMEM((1, C), jnp.float32)],
        compiler_params=pltpu.CompilerParams(
            dimension_semantics=("parallel", "arbitrary"),
            vmem_limit_bytes=pool_limit,
        ),
    )(xf, w1s, b1_2d, w2f, b2_2d)

    # Phase 2: out = x * a, streamed over HW tiles.
    out = pl.pallas_call(
        scale_kernel,
        out_shape=jax.ShapeDtypeStruct((B, C, HW), dtype),
        grid=(B, n_hw),
        in_specs=[
            pl.BlockSpec((1, C, 1), lambda b, t: (b, 0, 0)),
            pl.BlockSpec((1, C, hw_tile), lambda b, t: (b, 0, t)),
        ],
        out_specs=pl.BlockSpec((1, C, hw_tile), lambda b, t: (b, 0, t)),
        compiler_params=pltpu.CompilerParams(
            dimension_semantics=("parallel", "parallel"),
            vmem_limit_bytes=scale_limit,
        ),
    )(a, xf)
    return out


def se_module(x, w1, b1, w2, b2, *, target_block_bytes=8 * 1024 * 1024,
              min_grid_steps=4):
    """x: (B, C, H, W). w1: (C, Cs), b1: (Cs,), w2: (Cs, C), b2: (C,).
    Linear weights are stored pre-transposed so y = x @ w + b matches nn.Linear."""
    B, C, H, W = x.shape
    HW = H * W
    Cs = w1.shape[1]
    dtype = x.dtype
    itemsize = jnp.dtype(dtype).itemsize

    # Copy-free layout: pure reshape, no padding, no output slicing.
    xf = x.reshape(B, C, HW)

    # Fold the 1/HW mean normalization into W1: sum(x) @ (W1/HW) == mean(x) @ W1.
    w1s = w1.astype(jnp.float32) / float(HW)
    w2f = w2.astype(jnp.float32)
    b1_2d = b1.astype(jnp.float32).reshape(1, Cs)
    b2_2d = b2.astype(jnp.float32).reshape(1, C)

    weight_bytes = (C * Cs + Cs * C + Cs + C) * 4
    vmem_budget = _vmem_budget_bytes()
    slack = 4 << 20

    # Max bytes per x block: in + out blocks are each double-buffered (4x).
    block_cap = min(target_block_bytes,
                    max((vmem_budget - 2 * weight_bytes - slack) // 4, 0))
    per_image_bytes = C * HW * itemsize

    if per_image_bytes > block_cap:
        # A single image exceeds the fused budget (mostly v7x's 64 MiB VMEM):
        # fall back to the two-kernel excite + streaming-scale split.
        out = _se_large_image(xf, w1s, b1_2d, w2f, b2_2d, vmem_budget)
        return out.reshape(B, C, H, W)

    # Bblk = largest divisor of B that fits the cap and (when possible) leaves at
    # least min(min_grid_steps, B) grid steps (pipelining + v7x 2-TC sharding).
    steps_floor = min(min_grid_steps, B)
    bblk = 1
    for d in range(1, B + 1):
        if B % d == 0 and d * per_image_bytes <= block_cap and (B // d) >= steps_floor:
            bblk = d

    block_bytes = bblk * per_image_bytes
    vmem_needed = 4 * block_bytes + 2 * weight_bytes + slack
    # Never clamp below the computed need (need <= budget by construction).
    vmem_limit = int(min(vmem_budget, max(vmem_needed, 16 << 20)))

    cost = pl.CostEstimate(
        flops=4 * B * C * Cs + 2 * B * C * HW,          # two tiny GEMMs + pool/scale
        transcendentals=B * C,                          # sigmoid
        bytes_accessed=2 * B * C * HW * itemsize + weight_bytes,
    )

    out = pl.pallas_call(
        se_kernel,
        out_shape=jax.ShapeDtypeStruct((B, C, HW), dtype),
        grid=(B // bblk,),
        in_specs=[
            pl.BlockSpec((bblk, C, HW), lambda b: (b, 0, 0)),   # batch tile of x
            pl.BlockSpec((C, Cs), lambda b: (0, 0)),            # full (small) weights
            pl.BlockSpec((1, Cs), lambda b: (0, 0)),
            pl.BlockSpec((Cs, C), lambda b: (0, 0)),
            pl.BlockSpec((1, C), lambda b: (0, 0)),
        ],
        out_specs=pl.BlockSpec((bblk, C, HW), lambda b: (b, 0, 0)),
        compiler_params=pltpu.CompilerParams(
            dimension_semantics=("parallel",),
            vmem_limit_bytes=vmem_limit,
        ),
        cost_estimate=cost,
    )(xf, w1s, b1_2d, w2f, b2_2d)

    return out.reshape(B, C, H, W)


def se_module_ref(x, w1, b1, w2, b2):
    """Pure-JAX reference mirroring the PyTorch forward exactly."""
    s = jnp.mean(x, axis=(2, 3))                     # (B, C)  AdaptiveAvgPool2d(1)
    z = jnp.maximum(s @ w1 + b1, 0.0)                # Linear + ReLU
    a = jax.nn.sigmoid(z @ w2 + b2)                  # Linear + Sigmoid
    return x * a[:, :, None, None]


if __name__ == "__main__":
    # Shapes consistent with the module (squeeze_ratio=1.0 -> hidden == num_channel)
    B, C, H, W = 2, 4, 16, 16
    Cs = int(C * 1.0)

    key = jax.random.PRNGKey(0)
    kx, k1, k2, k3, k4 = jax.random.split(key, 5)

    x = jax.random.normal(kx, (B, C, H, W), dtype=jnp.float32)

    # Deterministic parameter init (Linear weights stored pre-transposed: (in, out)).
    bound1 = 1.0 / (C ** 0.5)
    w1 = jax.random.uniform(k1, (C, Cs), minval=-bound1, maxval=bound1, dtype=jnp.float32)
    b1 = jax.random.uniform(k2, (Cs,), minval=-bound1, maxval=bound1, dtype=jnp.float32)
    bound2 = 1.0 / (Cs ** 0.5)
    w2 = jax.random.uniform(k3, (Cs, C), minval=-bound2, maxval=bound2, dtype=jnp.float32)
    b2 = jax.random.uniform(k4, (C,), minval=-bound2, maxval=bound2, dtype=jnp.float32)

    out = se_module(x, w1, b1, w2, b2)
    out = jax.block_until_ready(out)

    ref = se_module_ref(x, w1, b1, w2, b2)
    assert out.shape == (B, C, H, W)
    assert jnp.allclose(out, ref, atol=1e-5, rtol=1e-5), "mismatch vs reference"

    print("KERNEL_OK")
</pallas_src>

<mosaic_0001>
module attributes {stable_mosaic.version = 11 : i64} {
  func.func @se_kernel(%arg0: i32, %arg1: memref<1x4x256xf32, #tpu.memory_space<vmem>>, %arg2: memref<4x4xf32, #tpu.memory_space<vmem>>, %arg3: memref<1x4xf32, #tpu.memory_space<vmem>>, %arg4: memref<4x4xf32, #tpu.memory_space<vmem>>, %arg5: memref<1x4xf32, #tpu.memory_space<vmem>>, %arg6: memref<1x4x256xf32, #tpu.memory_space<vmem>>) attributes {dimension_semantics = [#tpu.dimension_semantics<parallel>], iteration_bounds = array<i64: 2>, scalar_prefetch = 0 : i64, scratch_operands = 0 : i64, tpu.core_type = #tpu.core_type<tc>, window_params = [{transform_indices = @transform_0, window_bounds = array<i64: 1, 4, 256>}, {pipeline_mode = #tpu.pipeline_mode<synchronous>, transform_indices = @transform_1, window_bounds = array<i64: 4, 4>}, {pipeline_mode = #tpu.pipeline_mode<synchronous>, transform_indices = @transform_2, window_bounds = array<i64: 1, 4>}, {pipeline_mode = #tpu.pipeline_mode<synchronous>, transform_indices = @transform_3, window_bounds = array<i64: 4, 4>}, {pipeline_mode = #tpu.pipeline_mode<synchronous>, transform_indices = @transform_4, window_bounds = array<i64: 1, 4>}, {transform_indices = @transform_5, window_bounds = array<i64: 1, 4, 256>}]} {
    %c0 = arith.constant 0 : index
    %c0_0 = arith.constant 0 : index
    %c0_1 = arith.constant 0 : index
    %0 = vector.load %arg1[%c0, %c0_0, %c0_1] : memref<1x4x256xf32, #tpu.memory_space<vmem>>, vector<1x4x256xf32>
    %cst = arith.constant dense<0.000000e+00> : vector<1x4xf32>
    %1 = vector.multi_reduction <add>, %0, %cst [2] : vector<1x4x256xf32> to vector<1x4xf32>
    %c0_2 = arith.constant 0 : index
    %c0_3 = arith.constant 0 : index
    %2 = vector.load %arg2[%c0_2, %c0_3] : memref<4x4xf32, #tpu.memory_space<vmem>>, vector<4x4xf32>
    %cst_4 = arith.constant dense<0.000000e+00> : vector<1x4xf32>
    %3 = tpu.matmul %1, %2, %cst_4 {dimension_numbers = #tpu.dot_dimension_numbers<[1], [0], [0], [1], [0, 0, 1, 1], [], []>} : vector<1x4xf32>, vector<4x4xf32>, vector<1x4xf32> -> vector<1x4xf32>
    %c0_5 = arith.constant 0 : index
    %c0_6 = arith.constant 0 : index
    %4 = vector.load %arg3[%c0_5, %c0_6] : memref<1x4xf32, #tpu.memory_space<vmem>>, vector<1x4xf32>
    %5 = arith.addf %3, %4 : vector<1x4xf32>
    %cst_7 = arith.constant 0.000000e+00 : f32
    %6 = vector.broadcast %cst_7 : f32 to vector<1x4xf32>
    %7 = arith.maximumf %5, %6 : vector<1x4xf32>
    %c0_8 = arith.constant 0 : index
    %c0_9 = arith.constant 0 : index
    %8 = vector.load %arg4[%c0_8, %c0_9] : memref<4x4xf32, #tpu.memory_space<vmem>>, vector<4x4xf32>
    %cst_10 = arith.constant dense<0.000000e+00> : vector<1x4xf32>
    %9 = tpu.matmul %7, %8, %cst_10 {dimension_numbers = #tpu.dot_dimension_numbers<[1], [0], [0], [1], [0, 0, 1, 1], [], []>} : vector<1x4xf32>, vector<4x4xf32>, vector<1x4xf32> -> vector<1x4xf32>
    %c0_11 = arith.constant 0 : index
    %c0_12 = arith.constant 0 : index
    %10 = vector.load %arg5[%c0_11, %c0_12] : memref<1x4xf32, #tpu.memory_space<vmem>>, vector<1x4xf32>
    %11 = arith.addf %9, %10 : vector<1x4xf32>
    %12 = arith.negf %11 : vector<1x4xf32>
    %13 = math.exp %12 : vector<1x4xf32>
    %cst_13 = arith.constant 1.000000e+00 : f32
    %14 = vector.broadcast %cst_13 : f32 to vector<1x4xf32>
    %15 = arith.addf %14, %13 : vector<1x4xf32>
    %16 = arith.divf %14, %15 : vector<1x4xf32>
    %c0_14 = arith.constant 0 : index
    %c0_15 = arith.constant 0 : index
    %c0_16 = arith.constant 0 : index
    %17 = vector.load %arg1[%c0_14, %c0_15, %c0_16] : memref<1x4x256xf32, #tpu.memory_space<vmem>>, vector<1x4x256xf32>
    %18 = vector.shape_cast %16 : vector<1x4xf32> to vector<1x4x1xf32>
    %19 = vector.broadcast %18 : vector<1x4x1xf32> to vector<1x4x256xf32>
    %20 = arith.mulf %17, %19 : vector<1x4x256xf32>
    %c0_17 = arith.constant 0 : index
    %c0_18 = arith.constant 0 : index
    %c0_19 = arith.constant 0 : index
    %21 = vector.load %arg6[%c0_17, %c0_18, %c0_19] : memref<1x4x256xf32, #tpu.memory_space<vmem>>, vector<1x4x256xf32>
    tpu.vector_store %arg6[%c0_17, %c0_18, %c0_19], %20 {strides = array<i32>} : memref<1x4x256xf32, #tpu.memory_space<vmem>>, vector<1x4x256xf32>,
    return
  }
  func.func @transform_0(%arg0: i32) -> (i32, i32, i32) {
    %c0_i32 = arith.constant 0 : i32
    %c0_i32_0 = arith.constant 0 : i32
    %c0_i32_1 = arith.constant 0 : i32
    return %arg0, %c0_i32, %c0_i32_0 : i32, i32, i32
  }
  func.func @transform_1(%arg0: i32) -> (i32, i32) {
    %c0_i32 = arith.constant 0 : i32
    %c0_i32_0 = arith.constant 0 : i32
    %c0_i32_1 = arith.constant 0 : i32
    return %c0_i32, %c0_i32_0 : i32, i32
  }
  func.func @transform_2(%arg0: i32) -> (i32, i32) {
    %c0_i32 = arith.constant 0 : i32
    %c0_i32_0 = arith.constant 0 : i32
    %c0_i32_1 = arith.constant 0 : i32
    return %c0_i32, %c0_i32_0 : i32, i32
  }
  func.func @transform_3(%arg0: i32) -> (i32, i32) {
    %c0_i32 = arith.constant 0 : i32
    %c0_i32_0 = arith.constant 0 : i32
    %c0_i32_1 = arith.constant 0 : i32
    return %c0_i32, %c0_i32_0 : i32, i32
  }
  func.func @transform_4(%arg0: i32) -> (i32, i32) {
    %c0_i32 = arith.constant 0 : i32
    %c0_i32_0 = arith.constant 0 : i32
    %c0_i32_1 = arith.constant 0 : i32
    return %c0_i32, %c0_i32_0 : i32, i32
  }
  func.func @transform_5(%arg0: i32) -> (i32, i32, i32) {
    %c0_i32 = arith.constant 0 : i32
    %c0_i32_0 = arith.constant 0 : i32
    %c0_i32_1 = arith.constant 0 : i32
    return %arg0, %c0_i32, %c0_i32_0 : i32, i32, i32
  }
}

</mosaic_0001>

<bundles_post_ra>
// kernel: tpu_custom_call.1
= control target key start
LH: loop header
LB: loop body
LE: loop exit
PB: predicated region body
PF: predicated region fallthrough
CT: control target
= control target key end

     0   :  { %10 = vsyncpa [#allocation3], 0  ;;  %s1033_s0 = inlined_call_operand.hbm [shape: f32[2,4,256], index: 0, kind: input, shape index: {}]   ;;  %s1034_s1 = inlined_call_operand.hbm [shape: f32[4,4], index: 1, kind: input, shape index: {}]   ;;  %s1035_s2 = inlined_call_operand.vmem [shape: f32[1,4], index: 2, kind: input, shape index: {}]   ;;  %s1036_s3 = inlined_call_operand.vmem [shape: f32[4,4], index: 3, kind: input, shape index: {}]   ;;  %s1037_s4 = inlined_call_operand.vmem [shape: f32[1,4], index: 4, kind: input, shape index: {}]   ;;  %s1038_s5 = inlined_call_operand.hbm [shape: f32[2,4,256], index: 5, kind: output, shape index: {}]  }
   0x1   :  { %12 = vsyncpa [#allocation3 + $0x1], 0 }
   0x2   :  { %13 = vsyncpa [#allocation6], 0 }
   0x3   :  { %14 = vsyncpa [#allocation4], 0 }
   0x4   :  { %16 = vsyncpa [#allocation4 + $0x1], 0  ;;  %s815_s18 = smov 0   ;;  %s817_s19 = smov 0  }
   0x5   :  { %s819_s20 = smov 0   ;;  %s821_s21 = smov 0  }
   0x6 LB: > { %s836_s22 = sadd.s32 4294967295, %s777_s21   ;;  %s547_s23 = sadd.s32 4294967294, %s777_s21   ;;  %s777_s21 = sphi %s821_s21, %s1062_s21   ;;  %s773_s20 = sphi %s819_s20, %s1061_s20   ;;  %s769_s19 = sphi %s817_s19, %s1060_s19   ;;  %s765_s18 = sphi %s815_s18, %s1059_s18  }
   0x7   : > { %p42_p0 = scmp.ne.s32.totalorder %s769_s19, %s765_s18  ;;  %p1039_p1 = scmp.eq.s32.totalorder %s836_s22, 0 }
   0x8   : > { %p156_p3 = scmp.eq.s32.totalorder %s547_s23, 1  ;;  %p548_p5 = scmp.ge.s32.totalorder %s777_s21, 1 }
   0x9   : > { %p845_p4 = por %p1039_p1, %p42_p0  ;;  %p163_p7 = scmp.lt.s32.totalorder %s777_s21, 3 }
   0xa   : > { %p850_p6 = por %p156_p3, %p42_p0  ;;  %s779_s27 = smov [#allocation5]  }
   0xb   : > { %s1042_s24 = scalar_select %p845_p4, 1, 0 }
   0xc   : > { %s1043_s25 = scalar_select %p850_p6, 1, 0 }
   0xd   : > { %p855_p8 = pnand %p548_p5, %p163_p7  ;;  %s176_s28 = sshll.u32 %s779_s27, 4  ;;  %s177_s28 = int_to_ptr.vmem [resolvable:$true] %s176_s28 }
   0xe   : > { %s863_s29 = sadd.s32 1, %s777_s21   ;;  %s29_s8 = sadd.s32 1, %s773_s20 }
   0xf   : > { %s1044_s26 = scalar_select %p855_p8, 1, 0 }
  0x10   : > { %p592_p10 = pneg %p855_p8  ;;  %s26_s6 = ssub.s32 %s777_s21, %s863_s29 }
  0x11   : > { %p873_p12 = scmp.eq.s32.totalorder %s26_s6, 0  ;;  %s649_s11 = scalar_lea.hbm %s1034_s1, 64 }
  0x12   : > { %p867_p11 = pnand %p592_p10, %p1039_p1  ;;  %p650_p0 = scmp.ne.s32.totalorder %s1034_s1, %s649_s11 }
  0x13   : > { %s1046_s7 = scalar_select %p873_p12, 1, 0 }
  0x14   : > { %p651_p3 = pneg %p867_p11  ;;  %p656_p10 = scmp.lt.u32.totalorder %s649_s11, %s1034_s1 }
  0x16   : > { %p652_p5 = pnand %p651_p3, %p650_p0 }
  0x18   : > { %p653_p7 = pneg %p652_p5 }
  0x1a   : > { %p658_p9 = pnand %p656_p10, %p653_p7 }
  0x1c   : > { %661 = shalt.err (!%p658_p9)
}
  0x1d   : > { %s662_s16 = scalar_lea.vmem %s177_s28, 64  ;;  %p670_p6 = scmp.lt.s32.totalorder %s177_s28, %s177_s28 }
  0x1e   : > { %p663_p1 = scmp.ne.s32.totalorder %s177_s28, %s662_s16  ;;  %p671_p4 = scmp.lt.s32.totalorder %s662_s16, %s662_s16 }
  0x20   : > { %p665_p2 = pnand %p663_p1, %p651_p3  ;;  %p672_p8 = por %p671_p4, %p670_p6 }
  0x22   : > { %p666_p13 = pneg %p665_p2 }
  0x24   : > { %p673_p12 = pnand %p672_p8, %p666_p13 }
  0x26   : > { %676 = shalt.err (!%p673_p12)
}
  0x27   : > { %595 = dma.hbm_to_vmem [thread:$0]  (!%p867_p11), %s1034_s1, 64, %s177_s28, [#allocation6]  }
  0x28   : > { %p1047_p1 = scmp.ne.s32.totalorder %s1046_s7, 0  ;;  %p37_p2 = scmp.eq.s32.totalorder %s777_s21, 0 }
  0x29   : > { %p1048_p4 = scmp.ne.s32.totalorder %s773_s20, %s769_s19  ;;  %p1049_p6 = scmp.eq.s32.totalorder %s836_s22, 1 }
  0x2a   : > { %s899_s27 = scalar_select %p1047_p1, %s773_s20, %s29_s8  }
  0x2b   : > { %p907_p8 = por %p1049_p6, %p1048_p4  ;;  %p605_p9 = scmp.lt.s32.totalorder %s777_s21, 2 }
  0x2c   : > { %s196_s6 = sand.u32 1, %s773_s20   ;;  %p1051_p12 = pmov %p1048_p4 }
  0x2d   : > { %s551_s9 = sshll.u32 %s196_s6, 3  ;;  %s568_s10 = sshll.u32 %s777_s21, 7 }
  0x2e   : > { %p38_p13 = por %p37_p2, %p1051_p12  ;;  %s920_s28 = scalar_lea.hbm %s1033_s0, %s568_s10 }
  0x2f   : > { %s200_s7 = scalar_lea.vmem [#allocation2], %s551_s9  ;;  %s197_s14 = scalar_lea.sflag [#allocation3], %s196_s6 }
  0x30   : > { %s208_s8 = sshll.u32 %s200_s7, 4  ;;  %p922_p11 = pnand %p605_p9, %p38_p13  ;;  %s926_s8 = int_to_ptr.vmem [resolvable:$true] %s208_s8 }
  0x31   : > { %s677_s15 = scalar_lea.hbm %s920_s28, 128  ;;  %s682_s23 = scalar_lea.hbm %s1033_s0, 256 }
  0x32   : > { %p678_p0 = scmp.ne.s32.totalorder %s920_s28, %s677_s15  ;;  %p679_p3 = pneg %p922_p11 }
  0x33   : > { %p683_p10 = scmp.lt.u32.totalorder %s920_s28, %s1033_s0  ;;  %p684_p1 = scmp.lt.u32.totalorder %s682_s23, %s677_s15 }
  0x34   : > { %p680_p5 = pnand %p679_p3, %p678_p0  ;;  %p686_p4 = scmp.lt.u32.totalorder %s677_s15, %s920_s28 }
  0x35   : > { %p685_p2 = por %p684_p1, %p683_p10 }
  0x36   : > { %p681_p7 = pneg %p680_p5 }
  0x37   : > { %p687_p6 = por %p686_p4, %p685_p2 }
  0x39   : > { %p688_p9 = pnand %p687_p6, %p681_p7 }
  0x3b   : > { %691 = shalt.err (!%p688_p9)
}
  0x3c   : > { %s692_s6 = scalar_lea.vmem %s926_s8, 128  ;;  %s780_s11 = smov [#allocation2]  }
  0x3d   : > { %p693_p12 = scmp.ne.s32.totalorder %s926_s8, %s692_s6  ;;  %s697_s12 = sshll.u32 %s780_s11, 4  ;;  %s698_s12 = int_to_ptr.vmem [resolvable:$false] %s697_s12 }
  0x3e   : > { %s699_s7 = scalar_lea.vmem %s698_s12, 256  ;;  %p700_p5 = scmp.lt.s32.totalorder %s926_s8, %s698_s12 }
  0x3f   : > { %p695_p13 = pnand %p693_p12, %p679_p3  ;;  %p701_p10 = scmp.lt.s32.totalorder %s699_s7, %s692_s6 }
  0x41   : > { %p696_p0 = pneg %p695_p13  ;;  %p702_p1 = por %p701_p10, %p700_p5 }
  0x43   : > { %p703_p2 = pnand %p702_p1, %p696_p0 }
  0x45   : > { %706 = shalt.err (!%p703_p2)
}
  0x46   : > { %599 = dma.hbm_to_vmem [thread:$0]  (!%p922_p11), %s920_s28, 128, %s926_s8, %s197_s14  }
  0x47   : > { %p1053_p7 = scmp.ne.s32.totalorder %s1044_s26, 0 }
  0x48   : > { %s956_s15 = sand.u32 (!%p1053_p7), 1, %s769_s19   ;;  %p1054_p3 = scmp.ne.s32.totalorder (!%p1053_p7), %s1042_s24, 0 }
  0x49   : > { %217 = sbr.rel (%p1053_p7) target bundleno = 825 (0x339), region = 40  ;;  %s555_s16 = sshll.u32 (!%p1053_p7), %s956_s15, 3 }
  0x4a   : > { %s220_s17 = scalar_lea.sflag (!%p1053_p7), [#allocation3], %s956_s15  ;;  %s223_s23 = scalar_lea.vmem (!%p1053_p7), [#allocation2], %s555_s16 }
  0x50   : > { %752 = dma.done.wait (%p1054_p3), %s220_s17, 128  }
  0x51   : > { %754 = vsyncadd (%p1054_p3), %s220_s17, 4294967168  ;;  %p1055_p11 = scmp.eq.s32.totalorder %s836_s22, 0 }
  0x53   : > { %756 = dma.done.wait (%p1055_p11), [#allocation6], 64   ;;  %p1056_p4 = pmov %p1055_p11 }
  0x54   : > { %vm258_vm0 = vcmask 1043456   ;;  %v254_v0 = vld [vmem:[%s223_s23] sm:$0xff]  ;;  %v781_v5 = vmov 0.0   ;;  %v264_v6 = vld [vmem:[#allocation5] sm:$0xf]  ;;  %vm782_vm1 = vmmov 0   ;;  %v267_v7 = vlaneseq }
  0x55   : > { %758 = vsyncadd (%p1056_p4), [#allocation6], 4294967232  ;;  %v256_v1 = vcombine.high %v254_v0, %v254_v0  ;;  %v259_v2 = vsel %vm258_vm0, %v254_v0, 0.0  ;;  %574 = vmatprep.subr.mxu0 %v781_v5  ;;  %579 = vmatprep.subr.mxu1 %v781_v5  ;;  %vm273_vm2 = vcmask 31744   ;;  %v350_v13 = vld [vmem:[%s1036_s3] sm:$0xf] }
  0x56   : > { %575 = vmatpush3.msk.msra.mxu0 %vm258_vm0, %v264_v6  ;;  %576 = vmatprep.mubr.msk.f32.mxu0 %vm782_vm1, %v781_v5  ;;  %v268_v8 = vand.u32 127, %v267_v7  ;;  %v270_v9 = vshrl.u32 %v267_v7, 7  ;;  %v265_v14 = vld [vmem:[%s1035_s2] sm:$0x1]  ;;  %v783_v29 = vmov 839922192  }
  0x57   : > { %v260_v3 = vsel %vm258_vm0, %v256_v1, 0.0  ;;  %581 = vmatprep.mubr.msk.f32.mxu1 %vm782_vm1, %v781_v5  ;;  %580 = vmatpush3.msk.msra.mxu1 %vm258_vm0, %v350_v13  ;;  %v351_v19 = vld [vmem:[%s1037_s4] sm:$0x1]  ;;  %v443_v30 = vunpack.c.l.s4 %v783_v29  ;;  %s569_s9 = sshll.u32 %s836_s22, 7  ;;  %s253_s10 = scalar_lea.vmem [#allocation7], %s555_s16 }
  0x58   : > { %v261_v4 = vadd.f32 %v260_v3, %v259_v2  ;;  %v271_v10 = vsub.s32 %v268_v8, %v270_v9  ;;  %v436_v26 = vsub.s32 0, %v270_v9  ;;  %s467_s6 = sshll.u32 %s253_s10, 4  ;;  %s989_s7 = scalar_lea.hbm %s1038_s5, %s569_s9  ;;  %s991_s6 = int_to_ptr.vmem [resolvable:$true] %s467_s6 }
  0x59   : > { %v444_v31 = vunpack.c.0.s8 %v443_v30  ;;  %s453_s17 = scalar_lea.sflag [#allocation4], %s956_s15  ;;  %s707_s23 = scalar_lea.vmem %s991_s6, 128 }
  0x5a   : > { %262 = vadd.xlane.f32.xlu0 %v261_v4  ;;  %p708_p6 = scmp.ne.s32.totalorder %s991_s6, %s707_s23  ;;  %s784_s22 = smov [#allocation7]  }
  0x5b   : > { %v447_v32 = vsub.s32 %v444_v31, %v270_v9  ;;  %s711_s16 = sshll.u32 %s784_s22, 4  ;;  %s712_s16 = int_to_ptr.vmem [resolvable:$false] %s711_s16 }
  0x5c   : > { %p709_p9 = pnand %p708_p6, %p907_p8  ;;  %s713_s24 = scalar_lea.vmem %s712_s16, 256 }
  0x5d   : > { %p714_p13 = scmp.lt.s32.totalorder %s991_s6, %s712_s16  ;;  %p715_p0 = scmp.lt.s32.totalorder %s713_s24, %s707_s23 }
  0x5e   : > { %p710_p12 = pneg %p709_p9 }
  0x5f   : > { %p716_p5 = por %p715_p0, %p714_p13 }
  0x61   : > { %p717_p10 = pnand %p716_p5, %p710_p12 }
  0xe7   : > { %v263_v11 = vpop.xlane.xlu0 %262 }
  0xe8   : > { %v272_v12 = vrot.slane %v263_v11, %v271_v10 }
  0xea   : > { %577 = vmatmul.mubr.msk.f32.vlgmr.msra.gmra.mrb[0].mxu0 %vm273_vm2, %v272_v12 }
 0x1bd   : > { %v345_v15 = vpop.f32.mrb[0].mxu0 }
 0x1be   : > { %v346_v16 = vadd.f32 %v345_v15, %v265_v14  ;;  %v578_v17 = vpop.f32.mrb[1].mxu0 }
 0x1c0   : > { %v349_v18 = vmax.f32 %v346_v16, 0.0 }
 0x1c2   : > { %582 = vmatmul.mubr.msk.f32.vlgmr.msra.gmra.mrb[0].mxu1 %vm273_vm2, %v349_v18 }
 0x295   : > { %v424_v20 = vpop.f32.mrb[0].mxu1 }
 0x296   : > { %v425_v21 = vadd.f32 %v424_v20, %v351_v19  ;;  %v583_v22 = vpop.f32.mrb[1].mxu1 }
 0x298   : > { %v562_v23 = vmul.f32 -1.442695, %v425_v21 }
 0x29a   : > { %645 = vpow2.f32 %v562_v23 }
 0x2a4   : > { %v646_v24 = vpop.eup %645 }
 0x2a5   : > { %v431_v25 = vadd.f32 1.0, %v646_v24 }
 0x2a7   : > { %647 = vrcp.f32 %v431_v25 }
 0x2b1   : > { %v648_v27 = vpop.eup %647 }
 0x2b2   : > { %v437_v28 = vrot.slane %v648_v27, %v436_v26 }
 0x2b4   : > { %439 = vbcast.lane.b32.xlu0 %v437_v28, 256 }
 0x326   : > { %v440_v33 = vpop.permute.xlu0 %439 }
 0x327   : > { %v448_v34 = vrot.slane %v440_v33, %v447_v32 }
 0x329   : > { %v450_v35 = vmul.f32 %v448_v34, %v254_v0 }
 0x32b   : > { %451 = vst [vmem:[%s253_s10] sm:$0xff] %v450_v35 }
 0x32c   : > { %720 = shalt.err (!%p717_p10)
}
 0x32d   : > { %s721_s15 = scalar_lea.hbm %s989_s7, 128  ;;  %s725_s8 = scalar_lea.hbm %s1038_s5, 256 }
 0x32e   : > { %p722_p1 = scmp.ne.s32.totalorder %s989_s7, %s721_s15  ;;  %p726_p3 = scmp.lt.u32.totalorder %s989_s7, %s1038_s5 }
 0x32f   : > { %p727_p11 = scmp.lt.u32.totalorder %s725_s8, %s721_s15  ;;  %p729_p6 = scmp.lt.u32.totalorder %s721_s15, %s989_s7 }
 0x330   : > { %p723_p2 = pnand %p722_p1, %p907_p8 }
 0x331   : > { %p728_p4 = por %p727_p11, %p726_p3 }
 0x332   : > { %p724_p7 = pneg %p723_p2 }
 0x333   : > { %p730_p9 = por %p729_p6, %p728_p4 }
 0x335   : > { %p731_p12 = pnand %p730_p9, %p724_p7 }
 0x337   : > { %734 = shalt.err (!%p731_p12)
}
 0x338   : > { %590 = dma.vmem_to_hbm [thread:$0]  (%p907_p8), %s991_s6, 128, %s989_s7, %s453_s17  }
 0x339 PF: > { %s479_s9 = sand.u32 1, %s765_s18   ;;  %p1057_p13 = scmp.ne.s32.totalorder %s1043_s25, 0 }
 0x33a   : > { %p1058_p0 = scmp.ge.s32.totalorder %s777_s21, 2  ;;  %s480_s10 = scalar_lea.sflag [#allocation4], %s479_s9 }
 0x33c   : > { %p601_p5 = pnand %p1058_p0, %p1057_p13 }
 0x33e   : > { %760 = dma.done.wait (!%p601_p5), %s480_s10, 128  }
 0x33f   : > { %762 = vsyncadd (!%p601_p5), %s480_s10, 4294967168  ;;  %p19_p10 = scmp.ge.s32.totalorder %s863_s29, 4   ;;  %s1059_s18 = smov %s769_s19 }
 0x340   : > { %s1060_s19 = smov %s773_s20  ;;  %s1061_s20 = smov %s899_s27 }
 0x341   : > { %s1062_s21 = smov %s863_s29  ;;  %21 = sbr.rel (!%p19_p10) target bundleno = 6 (0x6), region = 89 }
 0x348   :  { %485 = vsyncpa [#allocation3], 1 }
 0x349   :  { %487 = vsyncpa [#allocation3 + $0x1], 1 }
 0x34a   :  { %488 = vsyncpa [#allocation6], 1 }
 0x34b   :  { %489 = vsyncpa [#allocation4], 1 }
 0x34c   :  { %491 = vsyncpa [#allocation4 + $0x1], 1 }

</bundles_post_ra>
